<compile_context>
chip_gen: v7x
topology: tpu7x:2x2x1
jax: 0.10.0
libtpu: 0.0.40
codegen_flags: <defaults>
</compile_context>

<pallas_src>
import functools

import jax
import jax.numpy as jnp
from jax.experimental import pallas as pl
from jax.experimental.pallas import tpu as pltpu

FEAT_C = 2048        # fixed by nn.Linear(2048, num_classes)
NUM_CLASSES = 10     # len(classes) from the dataframe; synthetic value here


def _head_kernel_eval(x_ref, w_ref, b_ref, o_ref, *, inv_hw):
    # x_ref: (tile_n, HW, C) bf16   — NHWC features, channels lane-dense
    # w_ref: (C, CLS_PAD)    bf16   — fc weight, zero-padded to 128 lanes
    # b_ref: (1, CLS_PAD)    f32
    # o_ref: (tile_n, CLS_PAD) f32
    pooled = jnp.sum(x_ref[...].astype(jnp.float32), axis=1) * inv_hw      # f32 accumulate
    o_ref[...] = (
        jnp.dot(pooled.astype(jnp.bfloat16), w_ref[...],
                preferred_element_type=jnp.float32)
        + b_ref[...]
    )


def _head_kernel_train(x_ref, m_ref, w_ref, b_ref, o_ref):
    # m_ref: (tile_n, C) f32 — dropout keep-mask with 1/HW and 1/(1-p) pre-folded
    pooled = jnp.sum(x_ref[...].astype(jnp.float32), axis=1)               # f32 accumulate
    dropped = pooled * m_ref[...]                                          # mean + dropout
    o_ref[...] = (
        jnp.dot(dropped.astype(jnp.bfloat16), w_ref[...],
                preferred_element_type=jnp.float32)
        + b_ref[...]
    )


def modified_resnet_head(features, w, b, *, dropout_key=None, training=True,
                         p=0.5, tile_n=None, data_format="NHWC"):
    """features: (N, H', W', 2048) (NHWC, bf16 preferred); w: (2048, num_classes); b: (num_classes,)."""
    if data_format == "NCHW":
        # TODO(synk): have the backbone emit NHWC directly; this transpose is an extra HBM pass.
        features = jnp.transpose(features, (0, 2, 3, 1))
    N, H, W, C = features.shape
    HW = H * W
    num_classes = w.shape[1]
    cls_pad = ((num_classes + 127) // 128) * 128     # lane-dense output width

    # free reshape (no transpose); bf16 halves the dominant HBM read
    x = features.reshape(N, HW, C).astype(jnp.bfloat16)

    # ---- batch tiling ----
    if tile_n is None:
        tile_n = 32
    if N < 16:
        # one block covering the whole (tiny) batch: keeps 2-D mask/output blocks legal
        tile_n = N
    else:
        # multiple of 8 (block constraint) and <= ceil(N/2) rounded to 8 (>=2 grid steps
        # so v7x megacore uses both TensorCores and the pipeline overlaps DMA/compute)
        tile_n = max(8, min((tile_n // 8) * 8, ((N + 1) // 2 // 8) * 8))
    n_pad = ((N + tile_n - 1) // tile_n) * tile_n
    if n_pad != N:
        x = jnp.pad(x, ((0, n_pad - N), (0, 0), (0, 0)))
    grid = (n_pad // tile_n,)

    # ---- classifier padded to 128 lanes, bf16 weights (MXU-native), f32 bias ----
    w_pad = jnp.zeros((C, cls_pad), jnp.bfloat16).at[:, :num_classes].set(
        w.astype(jnp.bfloat16))
    b_pad = jnp.zeros((1, cls_pad), jnp.float32).at[0, :num_classes].set(
        b.astype(jnp.float32))

    common = dict(
        out_shape=jax.ShapeDtypeStruct((n_pad, cls_pad), jnp.float32),
        grid=grid,
        out_specs=pl.BlockSpec((tile_n, cls_pad), lambda i: (i, 0)),
        compiler_params=pltpu.CompilerParams(
            dimension_semantics=("parallel",),         # shard batch tiles across TCs (v7x)
            vmem_limit_bytes=48 * 1024 * 1024,         # fits v7x 64 MiB, lifts v5e default
        ),
    )

    matmul_flops = 2 * n_pad * C * cls_pad
    pool_flops = n_pad * C * HW

    if training:
        if dropout_key is None:
            raise ValueError("training=True requires a fresh dropout_key every step")
        keep = jax.random.bernoulli(dropout_key, 1.0 - p, (n_pad, C))
        mask = keep.astype(jnp.float32) * (1.0 / ((1.0 - p) * HW))
        cost = pl.CostEstimate(
            flops=pool_flops + n_pad * C + matmul_flops,
            transcendentals=0,
            bytes_accessed=(x.size * 2 + mask.size * 4 + w_pad.size * 2
                            + b_pad.size * 4 + n_pad * cls_pad * 4),
        )
        out = pl.pallas_call(
            _head_kernel_train,
            in_specs=[
                pl.BlockSpec((tile_n, HW, C), lambda i: (i, 0, 0)),
                pl.BlockSpec((tile_n, C), lambda i: (i, 0)),
                pl.BlockSpec((C, cls_pad), lambda i: (0, 0)),
                pl.BlockSpec((1, cls_pad), lambda i: (0, 0)),
            ],
            cost_estimate=cost,
            **common,
        )(x, mask, w_pad, b_pad)
    else:
        cost = pl.CostEstimate(
            flops=pool_flops + n_pad * C + matmul_flops,
            transcendentals=0,
            bytes_accessed=(x.size * 2 + w_pad.size * 2
                            + b_pad.size * 4 + n_pad * cls_pad * 4),
        )
        out = pl.pallas_call(
            functools.partial(_head_kernel_eval, inv_hw=float(1.0 / HW)),
            in_specs=[
                pl.BlockSpec((tile_n, HW, C), lambda i: (i, 0, 0)),
                pl.BlockSpec((C, cls_pad), lambda i: (0, 0)),
                pl.BlockSpec((1, cls_pad), lambda i: (0, 0)),
            ],
            cost_estimate=cost,
            **common,
        )(x, w_pad, b_pad)

    return out[:N, :num_classes]


def _reference_head_eval(features_nhwc, w, b):
    """Pure-JAX reference for eval mode (dropout disabled), same bf16 matmul precision."""
    pooled = jnp.mean(features_nhwc.astype(jnp.float32), axis=(1, 2))      # (N, C) f32
    return (jnp.dot(pooled.astype(jnp.bfloat16), w.astype(jnp.bfloat16),
                    preferred_element_type=jnp.float32)
            + b.astype(jnp.float32))


if __name__ == "__main__":
    key = jax.random.PRNGKey(0)
    k_feat, k_w, k_b, k_drop = jax.random.split(key, 4)

    # Small synthetic backbone output: (N, H', W', 2048) NHWC, bf16 (TPU-native layout/dtype)
    N, Hf, Wf = 2, 4, 4
    features = jax.random.normal(k_feat, (N, Hf, Wf, FEAT_C),
                                 dtype=jnp.float32).astype(jnp.bfloat16)

    # Deterministic fc init (nn.Linear(2048, num_classes) shapes, stored (in, out)).
    limit = 1.0 / (FEAT_C ** 0.5)
    w = jax.random.uniform(k_w, (FEAT_C, NUM_CLASSES),
                           minval=-limit, maxval=limit, dtype=jnp.float32)
    b = jax.random.uniform(k_b, (NUM_CLASSES,),
                           minval=-limit, maxval=limit, dtype=jnp.float32)

    # Eval-mode run: must match the plain-JAX reference (bf16-matmul precision).
    out_eval = modified_resnet_head(features, w, b, training=False)
    out_eval = jax.block_until_ready(out_eval)
    ref_eval = _reference_head_eval(features, w, b)
    assert out_eval.shape == (N, NUM_CLASSES) and out_eval.dtype == jnp.float32
    assert jnp.allclose(out_eval, ref_eval, atol=2e-3, rtol=2e-3)

    # Training-mode run (dropout active; fresh key is mandatory).
    out_train = modified_resnet_head(features, w, b, dropout_key=k_drop, training=True)
    out_train = jax.block_until_ready(out_train)
    assert out_train.shape == (N, NUM_CLASSES) and out_train.dtype == jnp.float32
    assert bool(jnp.all(jnp.isfinite(out_train)))

    print("KERNEL_OK")
</pallas_src>

<mosaic_0001>
module attributes {stable_mosaic.version = 11 : i64} {
  func.func @_head_kernel_eval(%arg0: i32, %arg1: memref<2x16x2048xbf16, #tpu.memory_space<vmem>>, %arg2: memref<2048x128xbf16, #tpu.memory_space<vmem>>, %arg3: memref<1x128xf32, #tpu.memory_space<vmem>>, %arg4: memref<2x128xf32, #tpu.memory_space<vmem>>) attributes {dimension_semantics = [#tpu.dimension_semantics<parallel>], iteration_bounds = array<i64: 1>, scalar_prefetch = 0 : i64, scratch_operands = 0 : i64, tpu.core_type = #tpu.core_type<tc>, window_params = [{transform_indices = @transform_0, window_bounds = array<i64: 2, 16, 2048>}, {pipeline_mode = #tpu.pipeline_mode<synchronous>, transform_indices = @transform_1, window_bounds = array<i64: 2048, 128>}, {pipeline_mode = #tpu.pipeline_mode<synchronous>, transform_indices = @transform_2, window_bounds = array<i64: 1, 128>}, {transform_indices = @transform_3, window_bounds = array<i64: 2, 128>}]} {
    %c0 = arith.constant 0 : index
    %c0_0 = arith.constant 0 : index
    %c0_1 = arith.constant 0 : index
    %0 = vector.load %arg1[%c0, %c0_0, %c0_1] : memref<2x16x2048xbf16, #tpu.memory_space<vmem>>, vector<2x16x2048xbf16>
    %1 = arith.extf %0 : vector<2x16x2048xbf16> to vector<2x16x2048xf32>
    %cst = arith.constant dense<0.000000e+00> : vector<2x2048xf32>
    %2 = vector.multi_reduction <add>, %1, %cst [1] : vector<2x16x2048xf32> to vector<2x2048xf32>
    %cst_2 = arith.constant 6.250000e-02 : f32
    %3 = vector.broadcast %cst_2 : f32 to vector<2x2048xf32>
    %4 = arith.mulf %2, %3 : vector<2x2048xf32>
    %5 = arith.truncf %4 : vector<2x2048xf32> to vector<2x2048xbf16>
    %c0_3 = arith.constant 0 : index
    %c0_4 = arith.constant 0 : index
    %6 = vector.load %arg2[%c0_3, %c0_4] : memref<2048x128xbf16, #tpu.memory_space<vmem>>, vector<2048x128xbf16>
    %cst_5 = arith.constant dense<0.000000e+00> : vector<2x128xf32>
    %7 = tpu.matmul %5, %6, %cst_5 {dimension_numbers = #tpu.dot_dimension_numbers<[1], [0], [0], [1], [0, 0, 1, 1], [], []>} : vector<2x2048xbf16>, vector<2048x128xbf16>, vector<2x128xf32> -> vector<2x128xf32>
    %c0_6 = arith.constant 0 : index
    %c0_7 = arith.constant 0 : index
    %8 = vector.load %arg3[%c0_6, %c0_7] : memref<1x128xf32, #tpu.memory_space<vmem>>, vector<1x128xf32>
    %9 = vector.broadcast %8 : vector<1x128xf32> to vector<2x128xf32>
    %10 = arith.addf %7, %9 : vector<2x128xf32>
    %c0_8 = arith.constant 0 : index
    %c0_9 = arith.constant 0 : index
    %11 = vector.load %arg4[%c0_8, %c0_9] : memref<2x128xf32, #tpu.memory_space<vmem>>, vector<2x128xf32>
    tpu.vector_store %arg4[%c0_8, %c0_9], %10 {strides = array<i32>} : memref<2x128xf32, #tpu.memory_space<vmem>>, vector<2x128xf32>,
    return
  }
  func.func @transform_0(%arg0: i32) -> (i32, i32, i32) {
    %c0_i32 = arith.constant 0 : i32
    %c0_i32_0 = arith.constant 0 : i32
    %c0_i32_1 = arith.constant 0 : i32
    return %arg0, %c0_i32, %c0_i32_0 : i32, i32, i32
  }
  func.func @transform_1(%arg0: i32) -> (i32, i32) {
    %c0_i32 = arith.constant 0 : i32
    %c0_i32_0 = arith.constant 0 : i32
    %c0_i32_1 = arith.constant 0 : i32
    return %c0_i32, %c0_i32_0 : i32, i32
  }
  func.func @transform_2(%arg0: i32) -> (i32, i32) {
    %c0_i32 = arith.constant 0 : i32
    %c0_i32_0 = arith.constant 0 : i32
    %c0_i32_1 = arith.constant 0 : i32
    return %c0_i32, %c0_i32_0 : i32, i32
  }
  func.func @transform_3(%arg0: i32) -> (i32, i32) {
    %c0_i32 = arith.constant 0 : i32
    %c0_i32_0 = arith.constant 0 : i32
    return %arg0, %c0_i32 : i32, i32
  }
}

</mosaic_0001>

<bundles_post_ra>
// kernel: tpu_custom_call.1
= control target key start
LH: loop header
LB: loop body
LE: loop exit
PB: predicated region body
PF: predicated region fallthrough
CT: control target
= control target key end

     0   :  { %8 = vsyncpa [#allocation3], 0  ;;  %s2501_s0 = inlined_call_operand.hbm [shape: bf16[2,16,2048], index: 0, kind: input, shape index: {}]   ;;  %s2502_s1 = inlined_call_operand.hbm [shape: bf16[2048,128], index: 1, kind: input, shape index: {}]   ;;  %s2503_s2 = inlined_call_operand.vmem [shape: f32[1,128], index: 2, kind: input, shape index: {}]   ;;  %s2504_s3 = inlined_call_operand.hbm [shape: f32[2,128], index: 3, kind: output, shape index: {}]  }
   0x1   :  { %9 = vsyncpa [#allocation6], 0 }
   0x2   :  { %10 = vsyncpa [#allocation4], 0  ;;  %s2420_s12 = smov [#allocation2]   ;;  %s2348_s16 = scalar_lea.hbm %s2501_s0, 4096 }
   0x3   :  { %s16_s13 = sshll.u32 %s2420_s12, 4  ;;  %p2349_p0 = scmp.ne.s32.totalorder %s2501_s0, %s2348_s16  ;;  %s17_s13 = int_to_ptr.vmem [resolvable:$true] %s16_s13 }
   0x4   :  { %p2352_p1 = scmp.lt.u32.totalorder %s2348_s16, %s2501_s0 }
   0x6   :  { %p2354_p2 = pnand %p2352_p1, %p2349_p0 }
   0x8   :  { %2357 = shalt.err (!%p2354_p2)
}
   0x9   :  { %s2358_s21 = scalar_lea.vmem %s17_s13, 4096  ;;  %p2363_p4 = scmp.lt.s32.totalorder %s17_s13, %s17_s13 }
   0xa   :  { %p2359_p3 = scmp.ne.s32.totalorder %s17_s13, %s2358_s21  ;;  %p2364_p5 = scmp.lt.s32.totalorder %s2358_s21, %s2358_s21 }
   0xc   :  { %p2365_p6 = por %p2364_p5, %p2363_p4 }
   0xe   :  { %p2366_p7 = pnand %p2365_p6, %p2359_p3 }
  0x10   :  { %2369 = shalt.err (!%p2366_p7)
}
  0x11   :  { %s2421_s22 = smov 1024   ;;  %s2422_s23 = smov 64  }
  0x12   :  { %22 = dma.hbm_to_vmem [thread:$0]  %s2501_s0, 4096, %s17_s13, [#allocation3], %s2421_s22, %s2421_s22, %s2422_s23  }
  0x13   :  { %s2423_s26 = smov [#allocation5]   ;;  %s2370_s30 = scalar_lea.hbm %s2502_s1, 16384 }
  0x14   :  { %s28_s27 = sshll.u32 %s2423_s26, 4  ;;  %p2371_p8 = scmp.ne.s32.totalorder %s2502_s1, %s2370_s30  ;;  %s29_s27 = int_to_ptr.vmem [resolvable:$true] %s28_s27 }
  0x15   :  { %p2374_p9 = scmp.lt.u32.totalorder %s2370_s30, %s2502_s1 }
  0x17   :  { %p2376_p10 = pnand %p2374_p9, %p2371_p8 }
  0x19   :  { %2379 = shalt.err (!%p2376_p10)
}
  0x1a   :  { %s2380_s8 = scalar_lea.vmem %s29_s27, 16384  ;;  %p2385_p12 = scmp.lt.s32.totalorder %s29_s27, %s29_s27 }
  0x1b   :  { %p2381_p11 = scmp.ne.s32.totalorder %s29_s27, %s2380_s8  ;;  %p2386_p13 = scmp.lt.s32.totalorder %s2380_s8, %s2380_s8 }
  0x1d   :  { %p2387_p0 = por %p2386_p13, %p2385_p12 }
  0x1f   :  { %p2388_p1 = pnand %p2387_p0, %p2381_p11 }
  0x21   :  { %2391 = shalt.err (!%p2388_p1)
}
  0x22   :  { %s2424_s0 = smov 4  }
  0x23   :  { %34 = dma.hbm_to_vmem [thread:$0]  %s2502_s1, 16384, %s29_s27, [#allocation6], %s2422_s23, %s2422_s23, %s2424_s0  }
  0x24   :  { %2414 = dma.done.wait [#allocation3], 4096  }
  0x25   :  { %2415 = vsyncadd [#allocation3], 4294963200 }
  0x26   :  { %2416 = dma.done.wait [#allocation6], 16384  }
  0x27   :  { %2417 = vsyncadd [#allocation6], 4294950912  ;;  %v2220_v0 = vld [vmem:[#allocation5 + $0x40] sm:$0xff]   ;;  %v2224_v4 = vld [vmem:[#allocation5 + $0x48] sm:$0xff]   ;;  %vm755_vm0 = vcmask 1041409  }
  0x28   :  { %v2221_v1 = vld [vmem:[#allocation5 + $0xc0] sm:$0xff]   ;;  %2038 = vmatprep.subr.bf16.mxu0 %v2220_v0  ;;  %v2225_v5 = vld [vmem:[#allocation5 + $0xc8] sm:$0xff]   ;;  %v2228_v8 = vld [vmem:[#allocation5 + $0x50] sm:$0xff]  }
  0x29   :  { %v2222_v2 = vld [vmem:[#allocation5] sm:$0xff]   ;;  %2060 = vmatprep.subr.bf16.mxu1 %v2221_v1  ;;  %v2226_v6 = vld [vmem:[#allocation5 + $0x8] sm:$0xff]   ;;  %v2229_v9 = vld [vmem:[#allocation5 + $0xd0] sm:$0xff]  }
  0x2a   :  { %v2223_v3 = vld [vmem:[#allocation5 + $0x80] sm:$0xff]   ;;  %2039 = vmatpush3.bf16.msra.mxu0 %v2222_v2  ;;  %v2227_v7 = vld [vmem:[#allocation5 + $0x88] sm:$0xff]   ;;  %v2230_v10 = vld [vmem:[#allocation5 + $0x10] sm:$0xff]  }
  0x2b   :  { %2061 = vmatpush3.bf16.msra.mxu1 %v2223_v3  ;;  %2040 = vmatprep.subr.bf16.mxu0 %v2224_v4  ;;  %v2231_v11 = vld [vmem:[#allocation5 + $0x90] sm:$0xff]   ;;  %v2232_v12 = vld [vmem:[#allocation5 + $0x58] sm:$0xff]   ;;  %v2236_v16 = vld [vmem:[#allocation5 + $0x60] sm:$0xff]  }
  0x2c   :  { %2062 = vmatprep.subr.bf16.mxu1 %v2225_v5  ;;  %v2233_v13 = vld [vmem:[#allocation5 + $0xd8] sm:$0xff]   ;;  %v2237_v17 = vld [vmem:[#allocation5 + $0xe0] sm:$0xff]   ;;  %v2240_v20 = vld [vmem:[#allocation5 + $0x68] sm:$0xff]  }
  0x2d   :  { %v2234_v14 = vld [vmem:[#allocation5 + $0x18] sm:$0xff]   ;;  %v2238_v18 = vld [vmem:[#allocation5 + $0x20] sm:$0xff]   ;;  %v2241_v21 = vld [vmem:[#allocation5 + $0xe8] sm:$0xff]  }
  0x2e   :  { %2041 = vmatpush3.bf16.msra.mxu0 %v2226_v6  ;;  %v2235_v15 = vld [vmem:[#allocation5 + $0x98] sm:$0xff]   ;;  %v2239_v19 = vld [vmem:[#allocation5 + $0xa0] sm:$0xff]   ;;  %v2242_v22 = vld [vmem:[#allocation5 + $0x28] sm:$0xff]  }
  0x2f   :  { %2063 = vmatpush3.bf16.msra.mxu1 %v2227_v7  ;;  %2042 = vmatprep.subr.bf16.mxu0 %v2228_v8  ;;  %v2243_v23 = vld [vmem:[#allocation5 + $0xa8] sm:$0xff]   ;;  %v2244_v24 = vld [vmem:[#allocation5 + $0x70] sm:$0xff]   ;;  %v2248_v28 = vld [vmem:[#allocation5 + $0x78] sm:$0xff]  }
  0x30   :  { %2064 = vmatprep.subr.bf16.mxu1 %v2229_v9  ;;  %v2245_v25 = vld [vmem:[#allocation5 + $0xf0] sm:$0xff]   ;;  %v2249_v29 = vld [vmem:[#allocation5 + $0xf8] sm:$0xff]   ;;  %v44_v32 = vld [vmem:[#allocation2] sm:$0xff] }
  0x31   :  { %v2246_v26 = vld [vmem:[#allocation5 + $0x30] sm:$0xff]   ;;  %v2250_v30 = vld [vmem:[#allocation5 + $0x38] sm:$0xff]   ;;  %v52_v33 = vld [vmem:[#allocation2 + $0x40] sm:$0xff]  ;;  %v76_v36 = vunpack.c.l.bf16 %v44_v32  ;;  %v77_v37 = vunpack.c.h.bf16 %v44_v32 }
  0x32   :  { %2043 = vmatpush3.bf16.msra.mxu0 %v2230_v10  ;;  %v2247_v27 = vld [vmem:[#allocation5 + $0xb0] sm:$0xff]   ;;  %v2251_v31 = vld [vmem:[#allocation5 + $0xb8] sm:$0xff]   ;;  %v60_v34 = vld [vmem:[#allocation2 + $0x80] sm:$0xff]  ;;  %v92_v38 = vunpack.c.l.bf16 %v52_v33  ;;  %v93_v39 = vunpack.c.h.bf16 %v52_v33 }
  0x33   :  { %2065 = vmatpush3.bf16.msra.mxu1 %v2231_v11  ;;  %2044 = vmatprep.subr.bf16.mxu0 %v2232_v12  ;;  %v68_v35 = vld [vmem:[#allocation2 + $0xc0] sm:$0xff]  ;;  %v45_v40 = vld [vmem:[#allocation2 + $0x8] sm:$0xff]  ;;  %v108_v42 = vunpack.c.l.bf16 %v60_v34  ;;  %v109_v43 = vunpack.c.h.bf16 %v60_v34 }
  0x34   :  { %2066 = vmatprep.subr.bf16.mxu1 %v2233_v13  ;;  %v53_v41 = vld [vmem:[#allocation2 + $0x48] sm:$0xff]  ;;  %v124_v44 = vunpack.c.l.bf16 %v68_v35  ;;  %v125_v45 = vunpack.c.h.bf16 %v68_v35  ;;  %v147_v48 = vadd.f32 %v93_v39, %v77_v37  ;;  %v78_v49 = vunpack.c.l.bf16 %v45_v40  ;;  %v2252_v52 = vld [vmem:[#allocation5 + $0x140] sm:$0xff]  }
  0x35   :  { %v61_v46 = vld [vmem:[#allocation2 + $0x88] sm:$0xff]  ;;  %v79_v50 = vunpack.c.h.bf16 %v45_v40  ;;  %v94_v51 = vunpack.c.l.bf16 %v53_v41  ;;  %v95_v54 = vunpack.c.h.bf16 %v53_v41  ;;  %v2253_v57 = vld [vmem:[#allocation5 + $0x1c0] sm:$0xff]   ;;  %v140_v61 = vadd.f32 %v92_v38, %v76_v36 }
  0x36   :  { %2045 = vmatpush3.bf16.msra.mxu0 %v2234_v14  ;;  %v69_v47 = vld [vmem:[#allocation2 + $0xc8] sm:$0xff]  ;;  %v259_v53 = vadd.f32 %v125_v45, %v109_v43  ;;  %v110_v55 = vunpack.c.l.bf16 %v61_v46  ;;  %v111_v56 = vunpack.c.h.bf16 %v61_v46  ;;  %v148_v58 = vrot.slane %v147_v48, 4 }
  0x37   :  { %2067 = vmatpush3.bf16.msra.mxu1 %v2235_v15  ;;  %2046 = vmatprep.subr.bf16.mxu0 %v2236_v16  ;;  %v126_v59 = vunpack.c.l.bf16 %v69_v47  ;;  %v127_v60 = vunpack.c.h.bf16 %v69_v47  ;;  %v161_v63 = vadd.f32 %v95_v54, %v79_v50  ;;  %v252_v0 = vadd.f32 %v124_v44, %v108_v42 }
  0x38   :  { %2068 = vmatprep.subr.bf16.mxu1 %v2237_v17  ;;  %v260_v62 = vrot.slane %v259_v53, 4  ;;  %v154_v1 = vadd.f32 %v94_v51, %v78_v49  ;;  %v149_v2 = vadd.f32 %v148_v58, %v147_v48  ;;  %v141_v4 = vrot.slane %v140_v61, 4 }
  0x39   :  { %v273_v3 = vadd.f32 %v127_v60, %v111_v56  ;;  %v266_v5 = vadd.f32 %v126_v59, %v110_v55  ;;  %v162_v7 = vrot.slane %v161_v63, 4  ;;  %v253_v8 = vrot.slane %v252_v0, 4 }
  0x3a   :  { %2047 = vmatpush3.bf16.msra.mxu0 %v2238_v18  ;;  %v261_v6 = vadd.f32 %v260_v62, %v259_v53  ;;  %v155_v9 = vrot.slane %v154_v1, 4  ;;  %v150_v10 = vrot.slane %v149_v2, 2  ;;  %v142_v12 = vadd.f32 %v141_v4, %v140_v61 }
  0x3b   :  { %2069 = vmatpush3.bf16.msra.mxu1 %v2239_v19  ;;  %2048 = vmatprep.subr.bf16.mxu0 %v2240_v20  ;;  %v274_v11 = vrot.slane %v273_v3, 4  ;;  %v267_v13 = vrot.slane %v266_v5, 4  ;;  %v163_v15 = vadd.f32 %v162_v7, %v161_v63  ;;  %v254_v16 = vadd.f32 %v253_v8, %v252_v0 }
  0x3c   :  { %2070 = vmatprep.subr.bf16.mxu1 %v2241_v21  ;;  %v262_v14 = vrot.slane %v261_v6, 2  ;;  %v156_v17 = vadd.f32 %v155_v9, %v154_v1  ;;  %v151_v18 = vadd.f32 %v150_v10, %v149_v2  ;;  %v143_v20 = vrot.slane %v142_v12, 2 }
  0x3d   :  { %v275_v19 = vadd.f32 %v274_v11, %v273_v3  ;;  %v268_v21 = vadd.f32 %v267_v13, %v266_v5 }
  0x3e   :  { %2049 = vmatpush3.bf16.msra.mxu0 %v2242_v22  ;;  %v263_v22 = vadd.f32 %v262_v14, %v261_v6  ;;  %v2255_v14 = vld [vmem:[#allocation5 + $0x180] sm:$0xff]  }
  0x3f   :  { %2071 = vmatpush3.bf16.msra.mxu1 %v2243_v23  ;;  %2050 = vmatprep.subr.bf16.mxu0 %v2244_v24  ;;  %v164_v23 = vrot.slane %v163_v15, 2  ;;  %v255_v24 = vrot.slane %v254_v16, 2 }
  0x40   :  { %2072 = vmatprep.subr.bf16.mxu1 %v2245_v25  ;;  %v157_v25 = vrot.slane %v156_v17, 2 }
  0x41   :  { %v256_v32 = vadd.f32 %v255_v24, %v254_v16  ;;  %v2260_v24 = vld [vmem:[#allocation5 + $0x150] sm:$0xff]  }
  0x42   :  { %2051 = vmatpush3.bf16.msra.mxu0 %v2246_v26  ;;  %v152_v26 = vrot.slane %v151_v18, 1  ;;  %v158_v33 = vadd.f32 %v157_v25, %v156_v17  ;;  %v2261_v25 = vld [vmem:[#allocation5 + $0x1d0] sm:$0xff]  }
  0x43   :  { %2073 = vmatpush3.bf16.msra.mxu1 %v2247_v27  ;;  %2052 = vmatprep.subr.bf16.mxu0 %v2248_v28  ;;  %v276_v27 = vrot.slane %v275_v19, 2  ;;  %v144_v28 = vadd.f32 %v143_v20, %v142_v12  ;;  %v257_v40 = vrot.slane %v256_v32, 1  ;;  %v2254_v12 = vld [vmem:[#allocation5 + $0x100] sm:$0xff]  }
  0x44   :  { %2074 = vmatprep.subr.bf16.mxu1 %v2249_v29  ;;  %v269_v29 = vrot.slane %v268_v21, 2  ;;  %v153_v34 = vadd.f32 %v152_v26, %v151_v18  ;;  %v159_v41 = vrot.slane %v158_v33, 1  ;;  %v2256_v18 = vld [vmem:[#allocation5 + $0x148] sm:$0xff]   ;;  %v2262_v26 = vld [vmem:[#allocation5 + $0x110] sm:$0xff]  }
  0x45   :  { %v277_v35 = vadd.f32 %v276_v27, %v275_v19  ;;  %v145_v36 = vrot.slane %v144_v28, 1  ;;  %v258_v48 = vadd.f32 %v257_v40, %v256_v32  ;;  %v2263_v27 = vld [vmem:[#allocation5 + $0x190] sm:$0xff]   ;;  %v47_v40 = vld [vmem:[#allocation2 + $0x18] sm:$0xff] }
  0x46   :  { %2053 = vmatpush3.bf16.msra.mxu0 %v2250_v30  ;;  %v264_v30 = vrot.slane %v263_v22, 1  ;;  %v270_v37 = vadd.f32 %v269_v29, %v268_v21  ;;  %v365_v42 = vmul.f32 0.0625, %v153_v34  ;;  %v160_v49 = vadd.f32 %v159_v41, %v158_v33  ;;  %v2257_v21 = vld [vmem:[#allocation5 + $0x1c8] sm:$0xff]   ;;  %v2265_v29 = vld [vmem:[#allocation5 + $0x1d8] sm:$0xff]   ;;  %v46_v32 = vld [vmem:[#allocation2 + $0x10] sm:$0xff] }
  0x47   :  { %2075 = vmatpush3.bf16.msra.mxu1 %v2251_v31  ;;  %2082 = vmatprep.subr.bf16.mxu0 %v2252_v52  ;;  %v165_v31 = vadd.f32 %v164_v23, %v163_v15  ;;  %v278_v43 = vrot.slane %v277_v35, 1  ;;  %v146_v44 = vadd.f32 %v145_v36, %v144_v28  ;;  %v380_v56 = vmul.f32 0.0625, %v258_v48  ;;  %v2259_v23 = vld [vmem:[#allocation5 + $0x188] sm:$0xff]   ;;  %v2264_v28 = vld [vmem:[#allocation5 + $0x158] sm:$0xff]   ;;  %v54_v33 = vld [vmem:[#allocation2 + $0x50] sm:$0xff] }
  0x48   :  { %2104 = vmatprep.subr.bf16.mxu1 %v2253_v57  ;;  %v265_v38 = vadd.f32 %v264_v30, %v263_v22  ;;  %v271_v45 = vrot.slane %v270_v37, 1  ;;  %v397_v50 = vpack.c.bf16 %v365_v42, %v365_v42  ;;  %v366_v57 = vmul.f32 0.0625, %v160_v49  ;;  %v2258_v22 = vld [vmem:[#allocation5 + $0x108] sm:$0xff]   ;;  %v2266_v30 = vld [vmem:[#allocation5 + $0x118] sm:$0xff]   ;;  %v62_v34 = vld [vmem:[#allocation2 + $0x90] sm:$0xff] }
  0x49   :  { %v166_v39 = vrot.slane %v165_v31, 1  ;;  %v279_v51 = vadd.f32 %v278_v43, %v277_v35  ;;  %v364_v52 = vmul.f32 0.0625, %v146_v44  ;;  %v412_v0 = vpack.c.bf16 %v380_v56, %v380_v56  ;;  %v70_v35 = vld [vmem:[#allocation2 + $0xd0] sm:$0xff]  ;;  %v2267_v48 = vld [vmem:[#allocation5 + $0x198] sm:$0xff]  }
  0x4a   :  { %v381_v46 = vmul.f32 0.0625, %v265_v38  ;;  %v272_v53 = vadd.f32 %v271_v45, %v270_v37  ;;  %v724_v58 = vunpack.c.l.b16 %v397_v50  ;;  %v398_v1 = vpack.c.bf16 %v366_v57, %v366_v57  ;;  %v55_v45 = vld [vmem:[#allocation2 + $0x58] sm:$0xff] }
  0x4b   :  { %v167_v47 = vadd.f32 %v166_v39, %v165_v31  ;;  %v383_v59 = vmul.f32 0.0625, %v279_v51  ;;  %v396_v60 = vpack.c.bf16 %v364_v52, %v364_v52  ;;  %v739_v7 = vunpack.c.l.b16 %v412_v0  ;;  %v2268_v31 = vld [vmem:[#allocation5 + $0x160] sm:$0xff]  }
  0x4c   :  { %v413_v54 = vpack.c.bf16 %v381_v46, %v381_v46  ;;  %v382_v61 = vmul.f32 0.0625, %v272_v53  ;;  %v725_v8 = vunpack.c.l.b16 %v398_v1  ;;  %v80_v36 = vunpack.c.l.bf16 %v46_v32  ;;  %v63_v46 = vld [vmem:[#allocation2 + $0x98] sm:$0xff]  ;;  %v2269_v53 = vld [vmem:[#allocation5 + $0x1e0] sm:$0xff]  }
  0x4d   :  { %v367_v55 = vmul.f32 0.0625, %v167_v47  ;;  %v415_v2 = vpack.c.bf16 %v383_v59, %v383_v59  ;;  %v723_v3 = vunpack.c.l.b16 %v396_v60  ;;  %v81_v37 = vunpack.c.h.bf16 %v46_v32  ;;  %v71_v47 = vld [vmem:[#allocation2 + $0xd8] sm:$0xff] }
  0x4e   :  { %v740_v62 = vunpack.c.l.b16 %v413_v54  ;;  %v414_v4 = vpack.c.bf16 %v382_v61, %v382_v61  ;;  %v96_v38 = vunpack.c.l.bf16 %v54_v33  ;;  %v97_v39 = vunpack.c.h.bf16 %v54_v33 }
  0x4f   :  { %v399_v63 = vpack.c.bf16 %v367_v55, %v367_v55  ;;  %v742_v10 = vunpack.c.l.b16 %v415_v2  ;;  %v756_v13 = vsel %vm755_vm0, %v739_v7, %v723_v3  ;;  %v112_v41 = vunpack.c.l.bf16 %v62_v34 }
  0x50   :  { %v757_v5 = vsel %vm755_vm0, %v740_v62, %v724_v58  ;;  %v741_v11 = vunpack.c.l.b16 %v414_v4  ;;  %v772_v16 = vpack.c.b16 %v756_v13, %v756_v13  ;;  %v113_v42 = vunpack.c.h.bf16 %v62_v34  ;;  %v2270_v58 = vld [vmem:[#allocation5 + $0x120] sm:$0xff]   ;;  %v2278_v34 = vld [vmem:[#allocation5 + $0x130] sm:$0xff]  }
  0x51   :  { %v726_v6 = vunpack.c.l.b16 %v399_v63  ;;  %v773_v9 = vpack.c.b16 %v757_v5, %v757_v5  ;;  %v128_v43 = vunpack.c.l.bf16 %v70_v35  ;;  %v129_v44 = vunpack.c.h.bf16 %v70_v35  ;;  %v2272_v63 = vld [vmem:[#allocation5 + $0x168] sm:$0xff]   ;;  %v2271_v4 = vld [vmem:[#allocation5 + $0x1a0] sm:$0xff]  }
  0x52   :  { %v758_v17 = vsel %vm755_vm0, %v741_v11, %v725_v8  ;;  %v175_v49 = vadd.f32 %v97_v39, %v81_v37  ;;  %v82_v50 = vunpack.c.l.bf16 %v47_v40  ;;  %v83_v51 = vunpack.c.h.bf16 %v47_v40  ;;  %v2280_v39 = vld [vmem:[#allocation5 + $0x178] sm:$0xff]  }
  0x53   :  { %1604 = vmatprep.mubr.bf16.mxu0 %v773_v9  ;;  %v759_v15 = vsel %vm755_vm0, %v742_v10, %v726_v6  ;;  %v774_v20 = vpack.c.b16 %v758_v17, %v758_v17  ;;  %v98_v52 = vunpack.c.l.bf16 %v55_v45  ;;  %v287_v54 = vadd.f32 %v129_v44, %v113_v42  ;;  %v2273_v9 = vld [vmem:[#allocation5 + $0x1e8] sm:$0xff]   ;;  %v2279_v44 = vld [vmem:[#allocation5 + $0x1b0] sm:$0xff]  }
  0x54   :  { %v775_v19 = vpack.c.b16 %v759_v15, %v759_v15  ;;  %1605 = vmatmul.mubr.bf16.vlgmr.msra.gmra.mrb[0].mxu0 %v772_v16  ;;  %v99_v55 = vunpack.c.h.bf16 %v55_v45  ;;  %v114_v56 = vunpack.c.l.bf16 %v63_v46  ;;  %v115_v57 = vunpack.c.h.bf16 %v63_v46 }
  0x55   :  { %2083 = vmatpush3.bf16.msra.mxu0 %v2254_v12  ;;  %v176_v59 = vrot.slane %v175_v49, 4  ;;  %v130_v60 = vunpack.c.l.bf16 %v71_v47  ;;  %v131_v61 = vunpack.c.h.bf16 %v71_v47  ;;  %v168_v62 = vadd.f32 %v96_v38, %v80_v36 }
  0x56   :  { %1644 = vmatprep.mubr.bf16.mxu1 %v775_v19  ;;  %2084 = vmatprep.subr.bf16.mxu0 %v2256_v18  ;;  %v288_v0 = vrot.slane %v287_v54, 4  ;;  %v189_v1 = vadd.f32 %v99_v55, %v83_v51  ;;  %v280_v2 = vadd.f32 %v128_v43, %v112_v41  ;;  %v182_v3 = vadd.f32 %v98_v52, %v82_v50  ;;  %v2276_v19 = vld [vmem:[#allocation5 + $0x170] sm:$0xff]  }
  0x57   :  { %1645 = vmatmul.mubr.bf16.vlgmr.msra.gmra.mrb[0].mxu1 %v774_v20  ;;  %v177_v5 = vadd.f32 %v176_v59, %v175_v49  ;;  %v301_v6 = vadd.f32 %v131_v61, %v115_v57  ;;  %v169_v7 = vrot.slane %v168_v62, 4  ;;  %v294_v8 = vadd.f32 %v130_v60, %v114_v56  ;;  %v2281_v49 = vld [vmem:[#allocation5 + $0x1f8] sm:$0xff]  }
  0x58   :  { %2105 = vmatpush3.bf16.msra.mxu1 %v2255_v14  ;;  %v289_v10 = vadd.f32 %v288_v0, %v287_v54  ;;  %v190_v11 = vrot.slane %v189_v1, 4  ;;  %v281_v12 = vrot.slane %v280_v2, 4  ;;  %v183_v13 = vrot.slane %v182_v3, 4  ;;  %v2274_v14 = vld [vmem:[#allocation5 + $0x128] sm:$0xff]   ;;  %v2282_v54 = vld [vmem:[#allocation5 + $0x138] sm:$0xff]  }
  0x59   :  { %2106 = vmatprep.subr.bf16.mxu1 %v2257_v21  ;;  %2085 = vmatpush3.bf16.msra.mxu0 %v2258_v22  ;;  %v178_v15 = vrot.slane %v177_v5, 2  ;;  %v302_v16 = vrot.slane %v301_v6, 4  ;;  %v170_v17 = vadd.f32 %v169_v7, %v168_v62  ;;  %v295_v18 = vrot.slane %v294_v8, 4  ;;  %v2283_v0 = vld [vmem:[#allocation5 + $0x1b8] sm:$0xff]  }
  0x5a   :  { %2086 = vmatprep.subr.bf16.mxu0 %v2260_v24  ;;  %v290_v20 = vrot.slane %v289_v10, 2  ;;  %v191_v21 = vadd.f32 %v190_v11, %v189_v1  ;;  %v282_v22 = vadd.f32 %v281_v12, %v280_v2  ;;  %v2275_v24 = vld [vmem:[#allocation5 + $0x1a8] sm:$0xff]  }
  0x5c   :  { %2107 = vmatpush3.bf16.msra.mxu1 %v2259_v23  ;;  %v184_v23 = vadd.f32 %v183_v13, %v182_v3  ;;  %v283_v32 = vrot.slane %v282_v22, 2 }
  0x5d   :  { %2108 = vmatprep.subr.bf16.mxu1 %v2261_v25  ;;  %2087 = vmatpush3.bf16.msra.mxu0 %v2262_v26  ;;  %v179_v25 = vadd.f32 %v178_v15, %v177_v5  ;;  %v303_v26 = vadd.f32 %v302_v16, %v301_v6 }
  0x5e   :  { %2088 = vmatprep.subr.bf16.mxu0 %v2264_v28  ;;  %v296_v28 = vadd.f32 %v295_v18, %v294_v8  ;;  %v185_v33 = vrot.slane %v184_v23, 2  ;;  %v284_v42 = vadd.f32 %v283_v32, %v282_v22 }
  0x5f   :  { %v180_v35 = vrot.slane %v179_v25, 1  ;;  %v304_v36 = vrot.slane %v303_v26, 2 }
  0x60   :  { %2109 = vmatpush3.bf16.msra.mxu1 %v2263_v27  ;;  %v171_v27 = vrot.slane %v170_v17, 2  ;;  %v297_v38 = vrot.slane %v296_v28, 2  ;;  %v186_v43 = vadd.f32 %v185_v33, %v184_v23  ;;  %v285_v52 = vrot.slane %v284_v42, 1 }
  0x61   :  { %2110 = vmatprep.subr.bf16.mxu1 %v2265_v29  ;;  %2089 = vmatpush3.bf16.msra.mxu0 %v2266_v30  ;;  %v2277_v29 = vld [vmem:[#allocation5 + $0x1f0] sm:$0xff]   ;;  %v291_v30 = vadd.f32 %v290_v20, %v289_v10  ;;  %v181_v45 = vadd.f32 %v180_v35, %v179_v25  ;;  %v305_v46 = vadd.f32 %v304_v36, %v303_v26 }
  0x62   :  { %2090 = vmatprep.subr.bf16.mxu0 %v2268_v31  ;;  %v192_v31 = vrot.slane %v191_v21, 2  ;;  %v172_v37 = vadd.f32 %v171_v27, %v170_v17  ;;  %v286_v61 = vadd.f32 %v285_v52, %v284_v42  ;;  %v2294_v42 = vld [vmem:[#allocation5 + $0x210] sm:$0xff]   ;;  %v72_v52 = vld [vmem:[#allocation2 + $0xe0] sm:$0xff] }
  0x63   :  { %v292_v40 = vrot.slane %v291_v30, 1  ;;  %v369_v55 = vmul.f32 0.0625, %v181_v45  ;;  %v306_v56 = vrot.slane %v305_v46, 1  ;;  %v2297_v45 = vld [vmem:[#allocation5 + $0x2d8] sm:$0xff]  }
  0x64   :  { %2111 = vmatpush3.bf16.msra.mxu1 %v2267_v48  ;;  %v193_v41 = vadd.f32 %v192_v31, %v191_v21  ;;  %v173_v47 = vrot.slane %v172_v37, 1  ;;  %v298_v48 = vadd.f32 %v297_v38, %v296_v28  ;;  %v384_v7 = vmul.f32 0.0625, %v286_v61  ;;  %v2286_v28 = vld [vmem:[#allocation5 + $0x200] sm:$0xff]   ;;  %v2290_v38 = vld [vmem:[#allocation5 + $0x208] sm:$0xff]  }
  0x65   :  { %2112 = vmatprep.subr.bf16.mxu1 %v2269_v53  ;;  %2091 = vmatpush3.bf16.msra.mxu0 %v2270_v58  ;;  %v293_v50 = vadd.f32 %v292_v40, %v291_v30  ;;  %v187_v53 = vrot.slane %v186_v43, 1  ;;  %v401_v1 = vpack.c.bf16 %v369_v55, %v369_v55  ;;  %v307_v2 = vadd.f32 %v306_v56, %v305_v46  ;;  %v2287_v30 = vld [vmem:[#allocation5 + $0x280] sm:$0xff]   ;;  %v2292_v40 = vld [vmem:[#allocation5 + $0x250] sm:$0xff]   ;;  %v2298_v46 = vld [vmem:[#allocation5 + $0x218] sm:$0xff]  }
  0x66   :  { %2092 = vmatprep.subr.bf16.mxu0 %v2272_v63  ;;  %v194_v51 = vrot.slane %v193_v41, 1  ;;  %v174_v57 = vadd.f32 %v173_v47, %v172_v37  ;;  %v299_v58 = vrot.slane %v298_v48, 1  ;;  %v2284_v63 = vld [vmem:[#allocation5 + $0x240] sm:$0xff]   ;;  %v416_v16 = vpack.c.bf16 %v384_v7, %v384_v7  ;;  %v2289_v37 = vld [vmem:[#allocation5 + $0x2c8] sm:$0xff]  }
  0x67   :  { %v385_v59 = vmul.f32 0.0625, %v293_v50  ;;  %v188_v62 = vadd.f32 %v187_v53, %v186_v43  ;;  %v728_v10 = vunpack.c.l.b16 %v401_v1  ;;  %v387_v11 = vmul.f32 0.0625, %v307_v2  ;;  %v2295_v43 = vld [vmem:[#allocation5 + $0x290] sm:$0xff]   ;;  %v2300_v47 = vld [vmem:[#allocation5 + $0x260] sm:$0xff]   ;;  %v65_v61 = vld [vmem:[#allocation2 + $0xa8] sm:$0xff] }
  0x68   :  { %2113 = vmatpush3.bf16.msra.mxu1 %v2271_v4  ;;  %v195_v60 = vadd.f32 %v194_v51, %v193_v41  ;;  %v368_v3 = vmul.f32 0.0625, %v174_v57  ;;  %v300_v4 = vadd.f32 %v299_v58, %v298_v48  ;;  %v743_v23 = vunpack.c.l.b16 %v416_v16  ;;  %v2293_v41 = vld [vmem:[#allocation5 + $0x2d0] sm:$0xff]   ;;  %v48_v48 = vld [vmem:[#allocation2 + $0x20] sm:$0xff] }
  0x69   :  { %2114 = vmatprep.subr.bf16.mxu1 %v2273_v9  ;;  %2093 = vmatpush3.bf16.msra.mxu0 %v2274_v14  ;;  %v417_v5 = vpack.c.bf16 %v385_v59, %v385_v59  ;;  %v370_v8 = vmul.f32 0.0625, %v188_v62  ;;  %v2285_v9 = vld [vmem:[#allocation5 + $0x2c0] sm:$0xff]   ;;  %v419_v18 = vpack.c.bf16 %v387_v11, %v387_v11  ;;  %v84_v53 = vunpack.c.l.bf16 %v48_v48  ;;  %v49_v59 = vld [vmem:[#allocation2 + $0x28] sm:$0xff] }
  0x6a   :  { %2094 = vmatprep.subr.bf16.mxu0 %v2276_v19  ;;  %v371_v6 = vmul.f32 0.0625, %v195_v60  ;;  %v400_v12 = vpack.c.bf16 %v368_v3, %v368_v3  ;;  %v386_v13 = vmul.f32 0.0625, %v300_v4  ;;  %v56_v50 = vld [vmem:[#allocation2 + $0x60] sm:$0xff]  ;;  %v57_v60 = vld [vmem:[#allocation2 + $0x68] sm:$0xff]  ;;  %v132_v62 = vunpack.c.l.bf16 %v72_v52 }
  0x6b   :  { %v744_v14 = vunpack.c.l.b16 %v417_v5  ;;  %v402_v17 = vpack.c.bf16 %v370_v8, %v370_v8  ;;  %v746_v26 = vunpack.c.l.b16 %v419_v18  ;;  %v64_v51 = vld [vmem:[#allocation2 + $0xa0] sm:$0xff]  ;;  %v100_v55 = vunpack.c.l.bf16 %v56_v50 }
  0x6c   :  { %2115 = vmatpush3.bf16.msra.mxu1 %v2275_v24  ;;  %v403_v15 = vpack.c.bf16 %v371_v6, %v371_v6  ;;  %v727_v19 = vunpack.c.l.b16 %v400_v12  ;;  %v418_v20 = vpack.c.bf16 %v386_v13, %v386_v13  ;;  %v101_v56 = vunpack.c.h.bf16 %v56_v50  ;;  %v2301_v3 = vld [vmem:[#allocation5 + $0x2e0] sm:$0xff]   ;;  %v2304_v13 = vld [vmem:[#allocation5 + $0x268] sm:$0xff]  }
  0x6d   :  { %2116 = vmatprep.subr.bf16.mxu1 %v2277_v29  ;;  %2095 = vmatpush3.bf16.msra.mxu0 %v2278_v34  ;;  %v761_v21 = vsel %vm755_vm0, %v744_v14, %v728_v10  ;;  %v729_v24 = vunpack.c.l.b16 %v402_v17  ;;  %v2288_v34 = vld [vmem:[#allocation5 + $0x248] sm:$0xff]   ;;  %v116_v57 = vunpack.c.l.bf16 %v64_v51  ;;  %v117_v58 = vunpack.c.h.bf16 %v64_v51  ;;  %v2302_v8 = vld [vmem:[#allocation5 + $0x220] sm:$0xff]  }
  0x6e   :  { %2096 = vmatprep.subr.bf16.mxu0 %v2280_v39  ;;  %v730_v22 = vunpack.c.l.b16 %v403_v15  ;;  %v777_v25 = vpack.c.b16 %v761_v21, %v761_v21  ;;  %v745_v27 = vunpack.c.l.b16 %v418_v20  ;;  %v760_v29 = vsel %vm755_vm0, %v743_v23, %v727_v19  ;;  %v2291_v39 = vld [vmem:[#allocation5 + $0x288] sm:$0xff]   ;;  %v2303_v18 = vld [vmem:[#allocation5 + $0x2a0] sm:$0xff]  }
  0x6f   :  { %v776_v32 = vpack.c.b16 %v760_v29, %v760_v29  ;;  %v86_v1 = vunpack.c.l.bf16 %v49_v59  ;;  %v87_v2 = vunpack.c.h.bf16 %v49_v59  ;;  %v102_v5 = vunpack.c.l.bf16 %v57_v60  ;;  %v2305_v23 = vld [vmem:[#allocation5 + $0x2e8] sm:$0xff]  }
  0x70   :  { %2117 = vmatpush3.bf16.msra.mxu1 %v2279_v44  ;;  %1684 = vmatprep.mubr.bf16.mxu0 %v777_v25  ;;  %v763_v31 = vsel %vm755_vm0, %v746_v26, %v730_v22  ;;  %v762_v33 = vsel %vm755_vm0, %v745_v27, %v729_v24  ;;  %v2296_v44 = vld [vmem:[#allocation5 + $0x258] sm:$0xff]   ;;  %v103_v6 = vunpack.c.h.bf16 %v57_v60  ;;  %v118_v7 = vunpack.c.l.bf16 %v65_v61 }
  0x71   :  { %2118 = vmatprep.subr.bf16.mxu1 %v2281_v49  ;;  %2097 = vmatpush3.bf16.msra.mxu0 %v2282_v54  ;;  %v779_v35 = vpack.c.b16 %v763_v31, %v763_v31  ;;  %v778_v36 = vpack.c.b16 %v762_v33, %v762_v33  ;;  %v2299_v49 = vld [vmem:[#allocation5 + $0x298] sm:$0xff]   ;;  %v85_v54 = vunpack.c.h.bf16 %v48_v48  ;;  %v119_v10 = vunpack.c.h.bf16 %v65_v61  ;;  %v2308_v33 = vld [vmem:[#allocation5 + $0x270] sm:$0xff]  }
  0x72   :  { %2126 = vmatprep.subr.bf16.mxu0 %v2284_v63  ;;  %v133_v63 = vunpack.c.h.bf16 %v72_v52  ;;  %v217_v15 = vadd.f32 %v103_v6, %v87_v2  ;;  %v196_v16 = vadd.f32 %v100_v55, %v84_v53  ;;  %v308_v17 = vadd.f32 %v132_v62, %v116_v57  ;;  %v2310_v48 = vld [vmem:[#allocation5 + $0x230] sm:$0xff]   ;;  %v2312_v53 = vld [vmem:[#allocation5 + $0x278] sm:$0xff]  }
  0x73   :  { %1724 = vmatprep.mubr.bf16.mxu1 %v779_v35  ;;  %v203_v4 = vadd.f32 %v101_v56, %v85_v54  ;;  %v210_v21 = vadd.f32 %v102_v5, %v86_v1 }
  0x74   :  { %2119 = vmatpush3.bf16.msra.mxu1 %v2283_v0  ;;  %1685 = vmatmul.mubr.bf16.vlgmr.msra.gmra.mrb[4].mxu0 %v776_v32  ;;  %v73_v0 = vld [vmem:[#allocation2 + $0xe8] sm:$0xff]  ;;  %v218_v25 = vrot.slane %v217_v15, 4  ;;  %v197_v26 = vrot.slane %v196_v16, 4  ;;  %v309_v27 = vrot.slane %v308_v17, 4 }
  0x75   :  { %2148 = vmatprep.subr.bf16.mxu1 %v2285_v9  ;;  %2127 = vmatpush3.bf16.msra.mxu0 %v2286_v28  ;;  %v315_v9 = vadd.f32 %v133_v63, %v117_v58  ;;  %v134_v11 = vunpack.c.l.bf16 %v73_v0  ;;  %v135_v12 = vunpack.c.h.bf16 %v73_v0  ;;  %v204_v14 = vrot.slane %v203_v4, 4  ;;  %v2306_v28 = vld [vmem:[#allocation5 + $0x228] sm:$0xff]   ;;  %v2311_v58 = vld [vmem:[#allocation5 + $0x2b0] sm:$0xff]   ;;  %v2313_v63 = vld [vmem:[#allocation5 + $0x2f8] sm:$0xff]  }
  0x76   :  { %2128 = vmatprep.subr.bf16.mxu0 %v2288_v34  ;;  %v211_v31 = vrot.slane %v210_v21, 4  ;;  %v219_v35 = vadd.f32 %v218_v25, %v217_v15 }
  0x77   :  { %1725 = vmatmul.mubr.bf16.vlgmr.msra.gmra.mrb[4].mxu1 %v778_v36  ;;  %v316_v19 = vrot.slane %v315_v9, 4  ;;  %v329_v20 = vadd.f32 %v135_v12, %v119_v10  ;;  %v322_v22 = vadd.f32 %v134_v11, %v118_v7  ;;  %v205_v24 = vadd.f32 %v204_v14, %v203_v4  ;;  %v2314_v4 = vld [vmem:[#allocation5 + $0x238] sm:$0xff]  }
  0x78   :  { %2149 = vmatpush3.bf16.msra.mxu1 %v2287_v30  ;;  %v198_v36 = vadd.f32 %v197_v26, %v196_v16  ;;  %v2315_v14 = vld [vmem:[#allocation5 + $0x2b8] sm:$0xff]  }
  0x79   :  { %2150 = vmatprep.subr.bf16.mxu1 %v2289_v37  ;;  %2129 = vmatpush3.bf16.msra.mxu0 %v2290_v38  ;;  %v317_v29 = vadd.f32 %v316_v19, %v315_v9  ;;  %v330_v30 = vrot.slane %v329_v20, 4  ;;  %v323_v32 = vrot.slane %v322_v22, 4  ;;  %v206_v34 = vrot.slane %v205_v24, 2  ;;  %v2307_v38 = vld [vmem:[#allocation5 + $0x2a8] sm:$0xff]  }
  0x7a   :  { %2130 = vmatprep.subr.bf16.mxu0 %v2292_v40  ;;  %v310_v37 = vadd.f32 %v309_v27, %v308_v17 }
  0x7b   :  { %v331_v40 = vadd.f32 %v330_v30, %v329_v20 }
  0x7c   :  { %2151 = vmatpush3.bf16.msra.mxu1 %v2291_v39  ;;  %v318_v39 = vrot.slane %v317_v29, 2 }
  0x7d   :  { %2152 = vmatprep.subr.bf16.mxu1 %v2293_v41  ;;  %2131 = vmatpush3.bf16.msra.mxu0 %v2294_v42  ;;  %v212_v41 = vadd.f32 %v211_v31, %v210_v21  ;;  %v324_v42 = vadd.f32 %v323_v32, %v322_v22  ;;  %v332_v50 = vrot.slane %v331_v40, 2 }
  0x7e   :  { %2132 = vmatprep.subr.bf16.mxu0 %v2296_v44  ;;  %v207_v44 = vadd.f32 %v206_v34, %v205_v24 }
  0x7f   :  { %v213_v51 = vrot.slane %v212_v41, 2  ;;  %v325_v52 = vrot.slane %v324_v42, 2  ;;  %v333_v60 = vadd.f32 %v332_v50, %v331_v40  ;;  %v2320_v50 = vld [vmem:[#allocation5 + $0x348] sm:$0xff]  }
  0x80   :  { %2153 = vmatpush3.bf16.msra.mxu1 %v2295_v43  ;;  %v2309_v43 = vld [vmem:[#allocation5 + $0x2f0] sm:$0xff]   ;;  %v208_v54 = vrot.slane %v207_v44, 1 }
  0x81   :  { %2154 = vmatprep.subr.bf16.mxu1 %v2297_v45  ;;  %2133 = vmatpush3.bf16.msra.mxu0 %v2298_v46  ;;  %v220_v45 = vrot.slane %v219_v35, 2  ;;  %v199_v46 = vrot.slane %v198_v36, 2  ;;  %v214_v61 = vadd.f32 %v213_v51, %v212_v41  ;;  %v326_v62 = vadd.f32 %v325_v52, %v324_v42 }
  0x82   :  { %2134 = vmatprep.subr.bf16.mxu0 %v2300_v47  ;;  %v311_v47 = vrot.slane %v310_v37, 2  ;;  %v209_v0 = vadd.f32 %v208_v54, %v207_v44  ;;  %v334_v6 = vrot.slane %v333_v60, 1  ;;  %v2322_v54 = vld [vmem:[#allocation5 + $0x308] sm:$0xff]  }
  0x83   :  { %v221_v55 = vadd.f32 %v220_v45, %v219_v35  ;;  %v200_v56 = vadd.f32 %v199_v46, %v198_v36  ;;  %v215_v7 = vrot.slane %v214_v61, 1  ;;  %v2319_v46 = vld [vmem:[#allocation5 + $0x380] sm:$0xff]  }
  0x84   :  { %2155 = vmatpush3.bf16.msra.mxu1 %v2299_v49  ;;  %v319_v49 = vadd.f32 %v318_v39, %v317_v29  ;;  %v312_v57 = vadd.f32 %v311_v47, %v310_v37  ;;  %v373_v9 = vmul.f32 0.0625, %v209_v0  ;;  %v335_v16 = vadd.f32 %v334_v6, %v333_v60  ;;  %v2328_v60 = vld [vmem:[#allocation5 + $0x358] sm:$0xff]   ;;  %v50_v0 = vld [vmem:[#allocation2 + $0x30] sm:$0xff] }
  0x85   :  { %2156 = vmatprep.subr.bf16.mxu1 %v2301_v3  ;;  %2135 = vmatpush3.bf16.msra.mxu0 %v2302_v8  ;;  %v222_v1 = vrot.slane %v221_v55, 1  ;;  %v201_v2 = vrot.slane %v200_v56, 1  ;;  %v327_v8 = vrot.slane %v326_v62, 1  ;;  %v216_v17 = vadd.f32 %v215_v7, %v214_v61  ;;  %v2329_v61 = vld [vmem:[#allocation5 + $0x3d8] sm:$0xff]  }
  0x86   :  { %2136 = vmatprep.subr.bf16.mxu0 %v2304_v13  ;;  %v320_v59 = vrot.slane %v319_v49, 1  ;;  %v313_v3 = vrot.slane %v312_v57, 1  ;;  %v2316_v13 = vld [vmem:[#allocation5 + $0x340] sm:$0xff]   ;;  %v405_v19 = vpack.c.bf16 %v373_v9, %v373_v9  ;;  %v391_v25 = vmul.f32 0.0625, %v335_v16  ;;  %v59_v9 = vld [vmem:[#allocation2 + $0x78] sm:$0xff] }
  0x87   :  { %v223_v10 = vadd.f32 %v222_v1, %v221_v55  ;;  %v202_v11 = vadd.f32 %v201_v2, %v200_v56  ;;  %v374_v26 = vmul.f32 0.0625, %v216_v17  ;;  %v2323_v55 = vld [vmem:[#allocation5 + $0x388] sm:$0xff]   ;;  %v2324_v56 = vld [vmem:[#allocation5 + $0x350] sm:$0xff]   ;;  %v75_v16 = vld [vmem:[#allocation2 + $0xf8] sm:$0xff] }
  0x88   :  { %2157 = vmatpush3.bf16.msra.mxu1 %v2303_v18  ;;  %v321_v5 = vadd.f32 %v320_v59, %v319_v49  ;;  %v314_v12 = vadd.f32 %v313_v3, %v312_v57  ;;  %v328_v18 = vadd.f32 %v327_v8, %v326_v62  ;;  %v2325_v57 = vld [vmem:[#allocation5 + $0x3d0] sm:$0xff]   ;;  %v2330_v62 = vld [vmem:[#allocation5 + $0x318] sm:$0xff]   ;;  %v2333_v17 = vld [vmem:[#allocation5 + $0x3e0] sm:$0xff]  }
  0x89   :  { %2158 = vmatprep.subr.bf16.mxu1 %v2305_v23  ;;  %2137 = vmatpush3.bf16.msra.mxu0 %v2306_v28  ;;  %v375_v20 = vmul.f32 0.0625, %v223_v10  ;;  %v372_v21 = vmul.f32 0.0625, %v202_v11  ;;  %v2317_v23 = vld [vmem:[#allocation5 + $0x3c0] sm:$0xff]   ;;  %v732_v28 = vunpack.c.l.b16 %v405_v19  ;;  %v406_v34 = vpack.c.bf16 %v374_v26, %v374_v26  ;;  %v2327_v59 = vld [vmem:[#allocation5 + $0x390] sm:$0xff]   ;;  %v51_v8 = vld [vmem:[#allocation2 + $0x38] sm:$0xff] }
  0x8a   :  { %2138 = vmatprep.subr.bf16.mxu0 %v2308_v33  ;;  %v389_v15 = vmul.f32 0.0625, %v321_v5  ;;  %v388_v22 = vmul.f32 0.0625, %v314_v12  ;;  %v390_v27 = vmul.f32 0.0625, %v328_v18  ;;  %v423_v33 = vpack.c.bf16 %v391_v25, %v391_v25  ;;  %v58_v1 = vld [vmem:[#allocation2 + $0x70] sm:$0xff]  ;;  %v2331_v10 = vld [vmem:[#allocation5 + $0x398] sm:$0xff]  }
  0x8b   :  { %v407_v29 = vpack.c.bf16 %v375_v20, %v375_v20  ;;  %v404_v30 = vpack.c.bf16 %v372_v21, %v372_v21  ;;  %v733_v41 = vunpack.c.l.b16 %v406_v34  ;;  %v66_v2 = vld [vmem:[#allocation2 + $0xb0] sm:$0xff]  ;;  %v89_v5 = vunpack.c.h.bf16 %v50_v0 }
  0x8c   :  { %2159 = vmatpush3.bf16.msra.mxu1 %v2307_v38  ;;  %v421_v24 = vpack.c.bf16 %v389_v15, %v389_v15  ;;  %v420_v31 = vpack.c.bf16 %v388_v22, %v388_v22  ;;  %v422_v35 = vpack.c.bf16 %v390_v27, %v390_v27  ;;  %v750_v40 = vunpack.c.l.b16 %v423_v33  ;;  %v74_v3 = vld [vmem:[#allocation2 + $0xf0] sm:$0xff]  ;;  %v67_v15 = vld [vmem:[#allocation2 + $0xb8] sm:$0xff]  ;;  %v2334_v22 = vld [vmem:[#allocation5 + $0x320] sm:$0xff]  }
  0x8d   :  { %2160 = vmatprep.subr.bf16.mxu1 %v2309_v43  ;;  %2139 = vmatpush3.bf16.msra.mxu0 %v2310_v48  ;;  %v734_v36 = vunpack.c.l.b16 %v407_v29  ;;  %v731_v37 = vunpack.c.l.b16 %v404_v30  ;;  %v2318_v43 = vld [vmem:[#allocation5 + $0x300] sm:$0xff]   ;;  %v104_v6 = vunpack.c.l.bf16 %v58_v1  ;;  %v105_v7 = vunpack.c.h.bf16 %v58_v1  ;;  %v2336_v27 = vld [vmem:[#allocation5 + $0x368] sm:$0xff]  }
  0x8e   :  { %2140 = vmatprep.subr.bf16.mxu0 %v2312_v53  ;;  %v748_v32 = vunpack.c.l.b16 %v421_v24  ;;  %v747_v38 = vunpack.c.l.b16 %v420_v31  ;;  %v749_v42 = vunpack.c.l.b16 %v422_v35  ;;  %v2321_v53 = vld [vmem:[#allocation5 + $0x3c8] sm:$0xff]   ;;  %v120_v11 = vunpack.c.l.bf16 %v66_v2 }
  0x8f   :  { %v767_v47 = vsel %vm755_vm0, %v750_v40, %v734_v36  ;;  %v121_v12 = vunpack.c.h.bf16 %v66_v2  ;;  %v231_v18 = vadd.f32 %v105_v7, %v89_v5  ;;  %v90_v19 = vunpack.c.l.bf16 %v51_v8 }
  0x90   :  { %2161 = vmatpush3.bf16.msra.mxu1 %v2311_v58  ;;  %v765_v39 = vsel %vm755_vm0, %v748_v32, %v732_v28  ;;  %v764_v45 = vsel %vm755_vm0, %v747_v38, %v731_v37  ;;  %v766_v49 = vsel %vm755_vm0, %v749_v42, %v733_v41  ;;  %v783_v51 = vpack.c.b16 %v767_v47, %v767_v47  ;;  %v2326_v58 = vld [vmem:[#allocation5 + $0x310] sm:$0xff]   ;;  %v2335_v32 = vld [vmem:[#allocation5 + $0x3a0] sm:$0xff]   ;;  %v2337_v37 = vld [vmem:[#allocation5 + $0x3e8] sm:$0xff]  }
  0x91   :  { %2162 = vmatprep.subr.bf16.mxu1 %v2313_v63  ;;  %2141 = vmatpush3.bf16.msra.mxu0 %v2314_v4  ;;  %v781_v44 = vpack.c.b16 %v765_v39, %v765_v39  ;;  %v780_v48 = vpack.c.b16 %v764_v45, %v764_v45  ;;  %v782_v52 = vpack.c.b16 %v766_v49, %v766_v49  ;;  %v2332_v63 = vld [vmem:[#allocation5 + $0x360] sm:$0xff]   ;;  %v88_v4 = vunpack.c.l.bf16 %v50_v0  ;;  %v2338_v42 = vld [vmem:[#allocation5 + $0x328] sm:$0xff]   ;;  %v2340_v47 = vld [vmem:[#allocation5 + $0x370] sm:$0xff]  }
  0x92   :  { %2170 = vmatprep.subr.bf16.mxu0 %v2316_v13  ;;  %1804 = vmatprep.mubr.bf16.mxu1 %v783_v51  ;;  %v136_v13 = vunpack.c.l.bf16 %v74_v3  ;;  %v91_v20 = vunpack.c.h.bf16 %v51_v8  ;;  %v106_v21 = vunpack.c.l.bf16 %v59_v9  ;;  %v107_v24 = vunpack.c.h.bf16 %v59_v9  ;;  %v2343_v8 = vld [vmem:[#allocation5 + $0x3b0] sm:$0xff]  }
  0x93   :  { %1764 = vmatprep.mubr.bf16.mxu0 %v781_v44  ;;  %v122_v25 = vunpack.c.l.bf16 %v67_v15  ;;  %v123_v26 = vunpack.c.h.bf16 %v67_v15  ;;  %v232_v28 = vrot.slane %v231_v18, 4  ;;  %v138_v29 = vunpack.c.l.bf16 %v75_v16 }
  0x94   :  { %2163 = vmatpush3.bf16.msra.mxu1 %v2315_v14  ;;  %1765 = vmatmul.mubr.bf16.vlgmr.msra.gmra.mrb[8].mxu0 %v780_v48  ;;  %v137_v14 = vunpack.c.h.bf16 %v74_v3  ;;  %v139_v30 = vunpack.c.h.bf16 %v75_v16  ;;  %v224_v31 = vadd.f32 %v104_v6, %v88_v4  ;;  %v245_v34 = vadd.f32 %v107_v24, %v91_v20  ;;  %v2344_v3 = vld [vmem:[#allocation5 + $0x378] sm:$0xff]  }
  0x95   :  { %2192 = vmatprep.subr.bf16.mxu1 %v2317_v23  ;;  %2171 = vmatpush3.bf16.msra.mxu0 %v2318_v43  ;;  %v336_v35 = vadd.f32 %v136_v13, %v120_v11  ;;  %v238_v36 = vadd.f32 %v106_v21, %v90_v19  ;;  %v233_v38 = vadd.f32 %v232_v28, %v231_v18  ;;  %v2345_v13 = vld [vmem:[#allocation5 + $0x3f8] sm:$0xff]  }
  0x96   :  { %2172 = vmatprep.subr.bf16.mxu0 %v2320_v50  ;;  %v343_v23 = vadd.f32 %v137_v14, %v121_v12  ;;  %v357_v39 = vadd.f32 %v139_v30, %v123_v26  ;;  %v225_v40 = vrot.slane %v224_v31, 4  ;;  %v350_v41 = vadd.f32 %v138_v29, %v122_v25  ;;  %v2346_v18 = vld [vmem:[#allocation5 + $0x338] sm:$0xff]  }
  0x97   :  { %1805 = vmatmul.mubr.bf16.vlgmr.msra.gmra.mrb[8].mxu1 %v782_v52  ;;  %v246_v44 = vrot.slane %v245_v34, 4  ;;  %v337_v45 = vrot.slane %v336_v35, 4  ;;  %v234_v48 = vrot.slane %v233_v38, 2  ;;  %v2339_v52 = vld [vmem:[#allocation5 + $0x3a8] sm:$0xff]  }
  0x98   :  { %2193 = vmatpush3.bf16.msra.mxu1 %v2319_v46  ;;  %v344_v33 = vrot.slane %v343_v23, 4  ;;  %v239_v46 = vrot.slane %v238_v36, 4  ;;  %v358_v49 = vrot.slane %v357_v39, 4  ;;  %v226_v50 = vadd.f32 %v225_v40, %v224_v31 }
  0x99   :  { %2194 = vmatprep.subr.bf16.mxu1 %v2321_v53  ;;  %2173 = vmatpush3.bf16.msra.mxu0 %v2322_v54  ;;  %v351_v51 = vrot.slane %v350_v41, 4  ;;  %v247_v54 = vadd.f32 %v246_v44, %v245_v34 }
  0x9a   :  { %2174 = vmatprep.subr.bf16.mxu0 %v2324_v56  ;;  %v345_v43 = vadd.f32 %v344_v33, %v343_v23  ;;  %v240_v56 = vadd.f32 %v239_v46, %v238_v36 }
  0x9b   :  { %v248_v0 = vrot.slane %v247_v54, 2 }
  0x9c   :  { %2195 = vmatpush3.bf16.msra.mxu1 %v2323_v55  ;;  %v346_v53 = vrot.slane %v345_v43, 2  ;;  %v338_v55 = vadd.f32 %v337_v45, %v336_v35  ;;  %v241_v2 = vrot.slane %v240_v56, 2 }
  0x9d   :  { %2196 = vmatprep.subr.bf16.mxu1 %v2325_v57  ;;  %2175 = vmatpush3.bf16.msra.mxu0 %v2326_v58  ;;  %v2341_v57 = vld [vmem:[#allocation5 + $0x3f0] sm:$0xff]   ;;  %v235_v58 = vadd.f32 %v234_v48, %v233_v38 }
  0x9e   :  { %2176 = vmatprep.subr.bf16.mxu0 %v2328_v60  ;;  %v227_v60 = vrot.slane %v226_v50, 2  ;;  %v339_v1 = vrot.slane %v338_v55, 2  ;;  %v242_v12 = vadd.f32 %v241_v2, %v240_v56 }
  0x9f   :  { %v236_v4 = vrot.slane %v235_v58, 1 }
  0xa0   :  { %2197 = vmatpush3.bf16.msra.mxu1 %v2327_v59  ;;  %v359_v59 = vadd.f32 %v358_v49, %v357_v39  ;;  %v228_v6 = vadd.f32 %v227_v60, %v226_v50  ;;  %v340_v11 = vadd.f32 %v339_v1, %v338_v55  ;;  %v1909_v1 = vld [vmem:[%s2503_s2] ss:$0 sm:$0xff]  ;;  %s2425_s2 = smov [#allocation7]  }
  0xa1   :  { %2198 = vmatprep.subr.bf16.mxu1 %v2329_v61  ;;  %2177 = vmatpush3.bf16.msra.mxu0 %v2330_v62  ;;  %v352_v61 = vadd.f32 %v351_v51, %v350_v41  ;;  %v2342_v62 = vld [vmem:[#allocation5 + $0x330] sm:$0xff]   ;;  %v237_v14 = vadd.f32 %v236_v4, %v235_v58  ;;  %s1899_s12 = sshll.u32 %s2425_s2, 4  ;;  %s1900_s12 = int_to_ptr.vmem [resolvable:$true] %s1899_s12 }
  0xa2   :  { %2178 = vmatprep.subr.bf16.mxu0 %v2332_v63  ;;  %v347_v63 = vadd.f32 %v346_v53, %v345_v43  ;;  %v360_v5 = vrot.slane %v359_v59, 2  ;;  %v229_v16 = vrot.slane %v228_v6, 1  ;;  %v341_v21 = vrot.slane %v340_v11, 1  ;;  %s2392_s13 = scalar_lea.vmem %s1900_s12, 32  ;;  %p2397_p3 = scmp.lt.s32.totalorder %s1900_s12, %s1900_s12 }
  0xa3   :  { %v353_v7 = vrot.slane %v352_v61, 2  ;;  %v377_v23 = vmul.f32 0.0625, %v237_v14  ;;  %p2393_p2 = scmp.ne.s32.totalorder %s1900_s12, %s2392_s13  ;;  %p2398_p4 = scmp.lt.s32.totalorder %s2392_s13, %s2392_s13 }
  0xa4   :  { %2199 = vmatpush3.bf16.msra.mxu1 %v2331_v10  ;;  %v348_v9 = vrot.slane %v347_v63, 1  ;;  %v249_v10 = vadd.f32 %v248_v0, %v247_v54  ;;  %v361_v15 = vadd.f32 %v360_v5, %v359_v59  ;;  %v230_v25 = vadd.f32 %v229_v16, %v228_v6 }
  0xa5   :  { %2200 = vmatprep.subr.bf16.mxu1 %v2333_v17  ;;  %2179 = vmatpush3.bf16.msra.mxu0 %v2334_v22  ;;  %v354_v17 = vadd.f32 %v353_v7, %v352_v61  ;;  %v243_v22 = vrot.slane %v242_v12, 1  ;;  %v342_v30 = vadd.f32 %v341_v21, %v340_v11  ;;  %p2399_p5 = por %p2398_p4, %p2397_p3 }
  0xa6   :  { %2180 = vmatprep.subr.bf16.mxu0 %v2336_v27  ;;  %v349_v19 = vadd.f32 %v348_v9, %v347_v63  ;;  %v250_v20 = vrot.slane %v249_v10, 1  ;;  %v362_v24 = vrot.slane %v361_v15, 1  ;;  %v2347_v27 = vld [vmem:[#allocation5 + $0x3b8] sm:$0xff]   ;;  %v376_v34 = vmul.f32 0.0625, %v230_v25 }
  0xa7   :  { %v355_v26 = vrot.slane %v354_v17, 1  ;;  %v244_v31 = vadd.f32 %v243_v22, %v242_v12  ;;  %v392_v38 = vmul.f32 0.0625, %v342_v30  ;;  %p2400_p6 = pnand %p2399_p5, %p2393_p2 }
  0xa8   :  { %2201 = vmatpush3.bf16.msra.mxu1 %v2335_v32  ;;  %v393_v28 = vmul.f32 0.0625, %v349_v19  ;;  %v251_v29 = vadd.f32 %v250_v20, %v249_v10  ;;  %v409_v32 = vpack.c.bf16 %v377_v23, %v377_v23  ;;  %v363_v33 = vadd.f32 %v362_v24, %v361_v15 }
  0xa9   :  { %2202 = vmatprep.subr.bf16.mxu1 %v2337_v37  ;;  %2181 = vmatpush3.bf16.msra.mxu0 %v2338_v42  ;;  %v356_v35 = vadd.f32 %v355_v26, %v354_v17  ;;  %v378_v39 = vmul.f32 0.0625, %v244_v31  ;;  %v408_v42 = vpack.c.bf16 %v376_v34, %v376_v34  ;;  %v424_v46 = vpack.c.bf16 %v392_v38, %v392_v38 }
  0xaa   :  { %2182 = vmatprep.subr.bf16.mxu0 %v2340_v47  ;;  %v425_v36 = vpack.c.bf16 %v393_v28, %v393_v28  ;;  %v379_v37 = vmul.f32 0.0625, %v251_v29  ;;  %v736_v40 = vunpack.c.l.b16 %v409_v32  ;;  %v395_v41 = vmul.f32 0.0625, %v363_v33 }
  0xab   :  { %v394_v43 = vmul.f32 0.0625, %v356_v35  ;;  %v410_v47 = vpack.c.bf16 %v378_v39, %v378_v39  ;;  %v735_v49 = vunpack.c.l.b16 %v408_v42  ;;  %v751_v53 = vunpack.c.l.b16 %v424_v46 }
  0xac   :  { %2203 = vmatpush3.bf16.msra.mxu1 %v2339_v52  ;;  %v752_v44 = vunpack.c.l.b16 %v425_v36  ;;  %v411_v45 = vpack.c.bf16 %v379_v37, %v379_v37  ;;  %v427_v48 = vpack.c.bf16 %v395_v41, %v395_v41 }
  0xad   :  { %2204 = vmatprep.subr.bf16.mxu1 %v2341_v57  ;;  %2183 = vmatpush3.bf16.msra.mxu0 %v2342_v62  ;;  %v426_v50 = vpack.c.bf16 %v394_v43, %v394_v43  ;;  %v737_v54 = vunpack.c.l.b16 %v410_v47  ;;  %v768_v58 = vsel %vm755_vm0, %v751_v53, %v735_v49 }
  0xae   :  { %2184 = vmatprep.subr.bf16.mxu0 %v2344_v3  ;;  %v769_v51 = vsel %vm755_vm0, %v752_v44, %v736_v40  ;;  %v738_v52 = vunpack.c.l.b16 %v411_v45  ;;  %v754_v56 = vunpack.c.l.b16 %v427_v48  ;;  %v784_v60 = vpack.c.b16 %v768_v58, %v768_v58 }
  0xaf   :  { %v785_v55 = vpack.c.b16 %v769_v51, %v769_v51  ;;  %v753_v57 = vunpack.c.l.b16 %v426_v50 }
  0xb0   :  { %2205 = vmatpush3.bf16.msra.mxu1 %v2343_v8  ;;  %v771_v59 = vsel %vm755_vm0, %v754_v56, %v738_v52 }
  0xb1   :  { %2206 = vmatprep.subr.bf16.mxu1 %v2345_v13  ;;  %2185 = vmatpush3.bf16.msra.mxu0 %v2346_v18  ;;  %v770_v61 = vsel %vm755_vm0, %v753_v57, %v737_v54  ;;  %v787_v62 = vpack.c.b16 %v771_v59, %v771_v59 }
  0xb2   :  { %1844 = vmatprep.mubr.bf16.mxu0 %v785_v55  ;;  %v786_v63 = vpack.c.b16 %v770_v61, %v770_v61 }
  0xb3   :  { %1884 = vmatprep.mubr.bf16.mxu1 %v787_v62 }
  0xb4   :  { %2207 = vmatpush3.bf16.msra.mxu1 %v2347_v27  ;;  %1845 = vmatmul.mubr.bf16.vlgmr.msra.gmra.mrb[12].mxu0 %v784_v60 }
  0xb7   :  { %1885 = vmatmul.mubr.bf16.vlgmr.msra.gmra.mrb[12].mxu1 %v786_v63 }
 0x127   :  { %v2054_v0 = vpop.f32.mrb[0].mxu0 }
 0x128   :  { %v2055_v2 = vpop.f32.mrb[1].mxu0 }
 0x129   :  { %v2056_v4 = vadd.f32 %v2055_v2, %v2054_v0  ;;  %v2057_v5 = vpop.f32.mrb[2].mxu0 }
 0x12a   :  { %v2076_v3 = vpop.f32.mrb[0].mxu1  ;;  %v2058_v7 = vpop.f32.mrb[3].mxu0 }
 0x12b   :  { %v2077_v6 = vpop.f32.mrb[1].mxu1  ;;  %v1607_v8 = vadd.f32 %v2056_v4, %v1909_v1 }
 0x12c   :  { %v2078_v9 = vadd.f32 %v2077_v6, %v2076_v3  ;;  %v2079_v10 = vpop.f32.mrb[2].mxu1 }
 0x12d   :  { %v2080_v11 = vpop.f32.mrb[3].mxu1 }
 0x12e   :  { %v1647_v12 = vadd.f32 %v2078_v9, %v1607_v8 }
 0x147   :  { %v2098_v13 = vpop.f32.mrb[4].mxu0 }
 0x148   :  { %v2099_v14 = vpop.f32.mrb[5].mxu0 }
 0x149   :  { %v2100_v16 = vadd.f32 %v2099_v14, %v2098_v13  ;;  %v2101_v17 = vpop.f32.mrb[6].mxu0 }
 0x14a   :  { %v2120_v15 = vpop.f32.mrb[4].mxu1  ;;  %v2102_v19 = vpop.f32.mrb[7].mxu0 }
 0x14b   :  { %v2121_v18 = vpop.f32.mrb[5].mxu1  ;;  %v1687_v20 = vadd.f32 %v2100_v16, %v1647_v12 }
 0x14c   :  { %v2122_v21 = vadd.f32 %v2121_v18, %v2120_v15  ;;  %v2123_v22 = vpop.f32.mrb[6].mxu1 }
 0x14d   :  { %v2124_v23 = vpop.f32.mrb[7].mxu1 }
 0x14e   :  { %v1727_v24 = vadd.f32 %v2122_v21, %v1687_v20 }
 0x167   :  { %v2142_v25 = vpop.f32.mrb[8].mxu0 }
 0x168   :  { %v2143_v26 = vpop.f32.mrb[9].mxu0 }
 0x169   :  { %v2144_v28 = vadd.f32 %v2143_v26, %v2142_v25  ;;  %v2145_v29 = vpop.f32.mrb[10].mxu0 }
 0x16a   :  { %v2164_v27 = vpop.f32.mrb[8].mxu1  ;;  %v2146_v31 = vpop.f32.mrb[11].mxu0 }
 0x16b   :  { %v2165_v30 = vpop.f32.mrb[9].mxu1  ;;  %v1767_v32 = vadd.f32 %v2144_v28, %v1727_v24 }
 0x16c   :  { %v2166_v33 = vadd.f32 %v2165_v30, %v2164_v27  ;;  %v2167_v34 = vpop.f32.mrb[10].mxu1 }
 0x16d   :  { %v2168_v35 = vpop.f32.mrb[11].mxu1 }
 0x16e   :  { %v1807_v36 = vadd.f32 %v2166_v33, %v1767_v32 }
 0x187   :  { %v2186_v37 = vpop.f32.mrb[12].mxu0 }
 0x188   :  { %v2187_v38 = vpop.f32.mrb[13].mxu0 }
 0x189   :  { %v2188_v40 = vadd.f32 %v2187_v38, %v2186_v37  ;;  %v2189_v41 = vpop.f32.mrb[14].mxu0 }
 0x18a   :  { %v2208_v39 = vpop.f32.mrb[12].mxu1  ;;  %v2190_v43 = vpop.f32.mrb[15].mxu0 }
 0x18b   :  { %v2209_v42 = vpop.f32.mrb[13].mxu1  ;;  %v1847_v44 = vadd.f32 %v2188_v40, %v1807_v36 }
 0x18c   :  { %v2210_v45 = vadd.f32 %v2209_v42, %v2208_v39  ;;  %v2211_v46 = vpop.f32.mrb[14].mxu1 }
 0x18d   :  { %v2212_v47 = vpop.f32.mrb[15].mxu1 }
 0x18e   :  { %v1887_v48 = vadd.f32 %v2210_v45, %v1847_v44 }
 0x190   :  { %1892 = vst [vmem:[#allocation7] sm:$0x3] %v1887_v48 }
 0x191   :  { %2403 = shalt.err (!%p2400_p6)
}
 0x192   :  { %s2404_s16 = scalar_lea.hbm %s2504_s3, 32 }
 0x193   :  { %p2405_p7 = scmp.ne.s32.totalorder %s2504_s3, %s2404_s16  ;;  %p2408_p8 = scmp.lt.u32.totalorder %s2404_s16, %s2504_s3 }
 0x195   :  { %p2410_p9 = pnand %p2408_p8, %p2405_p7 }
 0x197   :  { %2413 = shalt.err (!%p2410_p9)
}
 0x198   :  { %1902 = dma.vmem_to_hbm [thread:$0]  %s1900_s12, 32, %s2504_s3, [#allocation4]  }
 0x199   :  { %2418 = dma.done.wait [#allocation4], 32  }
 0x19a   :  { %2419 = vsyncadd [#allocation4], 4294967264 }
 0x19b   :  { %1906 = vsyncpa [#allocation3], 1 }
 0x19c   :  { %1907 = vsyncpa [#allocation6], 1 }
 0x19d   :  { %1908 = vsyncpa [#allocation4], 1 }

</bundles_post_ra>
